<compile_context>
chip_gen: v6e
topology: v6e:2x2x1
jax: 0.10.0
libtpu: 0.0.40
codegen_flags: <defaults>
</compile_context>

<pallas_src>
import jax
import jax.numpy as jnp
from jax.experimental import pallas as pl
from jax.experimental.pallas import tpu as pltpu


def dqn_kernel(x_ref, w1_ref, b1_ref, w2_ref, b2_ref, w3_ref, b3_ref, o_ref):
    # fc1: bf16 MXU, f32 accumulate; bias-add + ReLU epilogue in bf16.
    h1 = jnp.dot(x_ref[...], w1_ref[...], preferred_element_type=jnp.float32)
    h1 = jnp.maximum(h1.astype(jnp.bfloat16) + b1_ref[...], jnp.bfloat16(0))
    # fc2 + relu
    h2 = jnp.dot(h1, w2_ref[...], preferred_element_type=jnp.float32)
    h2 = jnp.maximum(h2.astype(jnp.bfloat16) + b2_ref[...], jnp.bfloat16(0))
    # head (no activation), lane-dense padded N=128; final bias-add in f32, bf16 store.
    out = jnp.dot(h2, w3_ref[...], preferred_element_type=jnp.float32) + b3_ref[...]
    o_ref[...] = out.astype(o_ref.dtype)
    # TODO(synk): for action selection / TD targets, fuse argmax / Q(s,a) gather here
    # so only a (TB,128)-or-smaller slab is written instead of the full padded head.


def prepare_params(w1, b1, w2, b2, w3, b3):
    """One-time conversion to kernel-ready params (padded + bf16).

    Call once (and again only on parameter updates) so the per-forward path does
    no weight padding / dtype conversion.
    """
    state_dim, hidden = w1.shape
    action_dim = w3.shape[1]

    # K dim padded to a multiple of 16 (bf16 sublane packing); head padded to a
    # lane-dense multiple of 128 for an unmasked vst + full-N MXU.
    state_pad = max(16, pl.cdiv(state_dim, 16) * 16)
    head_pad = max(128, pl.cdiv(action_dim, 128) * 128)

    w1_p = jnp.pad(w1.astype(jnp.bfloat16), ((0, state_pad - state_dim), (0, 0)))
    w2_p = w2.astype(jnp.bfloat16)
    w3_p = jnp.pad(w3.astype(jnp.bfloat16), ((0, 0), (0, head_pad - action_dim)))
    b1_p = b1.reshape(1, hidden).astype(jnp.bfloat16)
    b2_p = b2.reshape(1, hidden).astype(jnp.bfloat16)
    b3_p = jnp.pad(b3.reshape(1, action_dim).astype(jnp.float32),
                   ((0, 0), (0, head_pad - action_dim)))
    return (w1_p, b1_p, w2_p, b2_p, w3_p, b3_p)


def dqn_forward(x, params, action_dim, *, block_batch=None, out_dtype=jnp.float32):
    batch, state_dim = x.shape
    w1, b1, w2, b2, w3, b3 = params
    state_pad, hidden = w1.shape
    head_pad = w3.shape[1]

    if block_batch is None:
        # Per-step work is tiny, so grid-step overhead dominates: use one 256-row
        # block for small batches, cap at 1024 rows/step for large training batches.
        # TODO(synk): on v7x pass block_batch = batch_pad // 2 so both TensorCores get work.
        block_batch = min(pl.cdiv(batch, 256) * 256, 1024)

    batch_pad = pl.cdiv(batch, block_batch) * block_batch

    # cast-then-pad: halve the bytes the pad writes back to HBM.
    x_p = x.astype(jnp.bfloat16)
    if batch_pad != batch or state_pad != state_dim:
        x_p = jnp.pad(x_p, ((0, batch_pad - batch), (0, state_pad - state_dim)))

    num_blocks = batch_pad // block_batch

    out_padded = pl.pallas_call(
        dqn_kernel,
        out_shape=jax.ShapeDtypeStruct((batch_pad, head_pad), jnp.bfloat16),
        grid=(num_blocks,),
        in_specs=[
            # x tile streams over the batch grid (double-buffered by Pallas)
            pl.BlockSpec((block_batch, state_pad), lambda i: (i, 0)),
            # weights/biases: constant index_map -> resident in VMEM across steps
            pl.BlockSpec((state_pad, hidden), lambda i: (0, 0)),
            pl.BlockSpec((1, hidden), lambda i: (0, 0)),
            pl.BlockSpec((hidden, hidden), lambda i: (0, 0)),
            pl.BlockSpec((1, hidden), lambda i: (0, 0)),
            pl.BlockSpec((hidden, head_pad), lambda i: (0, 0)),
            pl.BlockSpec((1, head_pad), lambda i: (0, 0)),
        ],
        out_specs=pl.BlockSpec((block_batch, head_pad), lambda i: (i, 0)),
        compiler_params=pltpu.CompilerParams(
            dimension_semantics=("parallel",)),
    )(x_p, w1, b1, w2, b2, w3, b3)

    # strip batch / head padding; up-cast of the tiny real slab is negligible.
    return out_padded[:batch, :action_dim].astype(out_dtype)


def init_linear(key, fan_in, fan_out):
    """Deterministic init mimicking PyTorch nn.Linear: U(-1/sqrt(fan_in), 1/sqrt(fan_in))."""
    kw, kb = jax.random.split(key)
    bound = 1.0 / jnp.sqrt(fan_in)
    w = jax.random.uniform(kw, (fan_in, fan_out), jnp.float32, -bound, bound)
    b = jax.random.uniform(kb, (1, fan_out), jnp.float32, -bound, bound)
    return w, b


def _ref_kernel_arith(x, w1, b1, w2, b2, w3, b3):
    """Pure-JAX reference mirroring the kernel's bf16 / f32-accumulate arithmetic."""
    h1 = jnp.dot(x.astype(jnp.bfloat16), w1.astype(jnp.bfloat16),
                 preferred_element_type=jnp.float32)
    h1 = jnp.maximum(h1.astype(jnp.bfloat16) + b1.astype(jnp.bfloat16),
                     jnp.bfloat16(0))
    h2 = jnp.dot(h1, w2.astype(jnp.bfloat16), preferred_element_type=jnp.float32)
    h2 = jnp.maximum(h2.astype(jnp.bfloat16) + b2.astype(jnp.bfloat16),
                     jnp.bfloat16(0))
    out = jnp.dot(h2, w3.astype(jnp.bfloat16),
                  preferred_element_type=jnp.float32) + b3
    return out.astype(jnp.bfloat16).astype(jnp.float32)


def _ref_f32(x, w1, b1, w2, b2, w3, b3):
    h1 = jnp.maximum(x @ w1 + b1, 0.0)
    h2 = jnp.maximum(h1 @ w2 + b2, 0.0)
    return h2 @ w3 + b3


if __name__ == "__main__":
    state_space_dim = 4
    action_space_dim = 2
    hidden = 128
    batch = 200  # not a multiple of 256 -> exercises batch padding; single grid step

    key = jax.random.PRNGKey(0)
    k_x, k1, k2, k3 = jax.random.split(key, 4)

    x = jax.random.normal(k_x, (batch, state_space_dim), jnp.float32)
    w1, b1 = init_linear(k1, state_space_dim, hidden)
    w2, b2 = init_linear(k2, hidden, hidden)
    w3, b3 = init_linear(k3, hidden, action_space_dim)

    # hoisted once out of the per-call path (re-run only on parameter updates)
    params = prepare_params(w1, b1, w2, b2, w3, b3)

    out = dqn_forward(x, params, action_space_dim)
    out = jax.block_until_ready(out)

    assert out.shape == (batch, action_space_dim)

    # tight check against a reference mirroring the kernel's bf16/f32 arithmetic
    ref_bf16 = _ref_kernel_arith(x, w1, b1, w2, b2, w3, b3)
    assert jnp.allclose(out, ref_bf16, atol=1e-2, rtol=1e-2)

    # loose sanity check against the full-f32 forward of the original module
    ref_f32 = _ref_f32(x, w1, b1, w2, b2, w3, b3)
    assert jnp.allclose(out, ref_f32, atol=5e-2, rtol=5e-2)

    print("KERNEL_OK")
</pallas_src>

<mosaic_0001>
module attributes {stable_mosaic.version = 11 : i64} {
  func.func @dqn_kernel(%arg0: i32, %arg1: memref<256x16xbf16, #tpu.memory_space<vmem>>, %arg2: memref<16x128xbf16, #tpu.memory_space<vmem>>, %arg3: memref<1x128xbf16, #tpu.memory_space<vmem>>, %arg4: memref<128x128xbf16, #tpu.memory_space<vmem>>, %arg5: memref<1x128xbf16, #tpu.memory_space<vmem>>, %arg6: memref<128x128xbf16, #tpu.memory_space<vmem>>, %arg7: memref<1x128xf32, #tpu.memory_space<vmem>>, %arg8: memref<256x128xbf16, #tpu.memory_space<vmem>>) attributes {dimension_semantics = [#tpu.dimension_semantics<parallel>], iteration_bounds = array<i64: 1>, scalar_prefetch = 0 : i64, scratch_operands = 0 : i64, tpu.core_type = #tpu.core_type<tc>, window_params = [{transform_indices = @transform_0, window_bounds = array<i64: 256, 16>}, {pipeline_mode = #tpu.pipeline_mode<synchronous>, transform_indices = @transform_1, window_bounds = array<i64: 16, 128>}, {pipeline_mode = #tpu.pipeline_mode<synchronous>, transform_indices = @transform_2, window_bounds = array<i64: 1, 128>}, {pipeline_mode = #tpu.pipeline_mode<synchronous>, transform_indices = @transform_3, window_bounds = array<i64: 128, 128>}, {pipeline_mode = #tpu.pipeline_mode<synchronous>, transform_indices = @transform_4, window_bounds = array<i64: 1, 128>}, {pipeline_mode = #tpu.pipeline_mode<synchronous>, transform_indices = @transform_5, window_bounds = array<i64: 128, 128>}, {pipeline_mode = #tpu.pipeline_mode<synchronous>, transform_indices = @transform_6, window_bounds = array<i64: 1, 128>}, {transform_indices = @transform_7, window_bounds = array<i64: 256, 128>}]} {
    %c0 = arith.constant 0 : index
    %c0_0 = arith.constant 0 : index
    %0 = vector.load %arg1[%c0, %c0_0] : memref<256x16xbf16, #tpu.memory_space<vmem>>, vector<256x16xbf16>
    %c0_1 = arith.constant 0 : index
    %c0_2 = arith.constant 0 : index
    %1 = vector.load %arg2[%c0_1, %c0_2] : memref<16x128xbf16, #tpu.memory_space<vmem>>, vector<16x128xbf16>
    %cst = arith.constant dense<0.000000e+00> : vector<256x128xf32>
    %2 = tpu.matmul %0, %1, %cst {dimension_numbers = #tpu.dot_dimension_numbers<[1], [0], [0], [1], [0, 0, 1, 1], [], []>} : vector<256x16xbf16>, vector<16x128xbf16>, vector<256x128xf32> -> vector<256x128xf32>
    %3 = arith.truncf %2 : vector<256x128xf32> to vector<256x128xbf16>
    %c0_3 = arith.constant 0 : index
    %c0_4 = arith.constant 0 : index
    %4 = vector.load %arg3[%c0_3, %c0_4] : memref<1x128xbf16, #tpu.memory_space<vmem>>, vector<1x128xbf16>
    %5 = vector.broadcast %4 : vector<1x128xbf16> to vector<256x128xbf16>
    %6 = arith.addf %3, %5 : vector<256x128xbf16>
    %cst_5 = arith.constant 0.000000e+00 : bf16
    %7 = vector.broadcast %cst_5 : bf16 to vector<256x128xbf16>
    %8 = arith.maximumf %6, %7 : vector<256x128xbf16>
    %c0_6 = arith.constant 0 : index
    %c0_7 = arith.constant 0 : index
    %9 = vector.load %arg4[%c0_6, %c0_7] : memref<128x128xbf16, #tpu.memory_space<vmem>>, vector<128x128xbf16>
    %cst_8 = arith.constant dense<0.000000e+00> : vector<256x128xf32>
    %10 = tpu.matmul %8, %9, %cst_8 {dimension_numbers = #tpu.dot_dimension_numbers<[1], [0], [0], [1], [0, 0, 1, 1], [], []>} : vector<256x128xbf16>, vector<128x128xbf16>, vector<256x128xf32> -> vector<256x128xf32>
    %11 = arith.truncf %10 : vector<256x128xf32> to vector<256x128xbf16>
    %c0_9 = arith.constant 0 : index
    %c0_10 = arith.constant 0 : index
    %12 = vector.load %arg5[%c0_9, %c0_10] : memref<1x128xbf16, #tpu.memory_space<vmem>>, vector<1x128xbf16>
    %13 = vector.broadcast %12 : vector<1x128xbf16> to vector<256x128xbf16>
    %14 = arith.addf %11, %13 : vector<256x128xbf16>
    %cst_11 = arith.constant 0.000000e+00 : bf16
    %15 = vector.broadcast %cst_11 : bf16 to vector<256x128xbf16>
    %16 = arith.maximumf %14, %15 : vector<256x128xbf16>
    %c0_12 = arith.constant 0 : index
    %c0_13 = arith.constant 0 : index
    %17 = vector.load %arg6[%c0_12, %c0_13] : memref<128x128xbf16, #tpu.memory_space<vmem>>, vector<128x128xbf16>
    %cst_14 = arith.constant dense<0.000000e+00> : vector<256x128xf32>
    %18 = tpu.matmul %16, %17, %cst_14 {dimension_numbers = #tpu.dot_dimension_numbers<[1], [0], [0], [1], [0, 0, 1, 1], [], []>} : vector<256x128xbf16>, vector<128x128xbf16>, vector<256x128xf32> -> vector<256x128xf32>
    %c0_15 = arith.constant 0 : index
    %c0_16 = arith.constant 0 : index
    %19 = vector.load %arg7[%c0_15, %c0_16] : memref<1x128xf32, #tpu.memory_space<vmem>>, vector<1x128xf32>
    %20 = vector.broadcast %19 : vector<1x128xf32> to vector<256x128xf32>
    %21 = arith.addf %18, %20 : vector<256x128xf32>
    %22 = arith.truncf %21 : vector<256x128xf32> to vector<256x128xbf16>
    %c0_17 = arith.constant 0 : index
    %c0_18 = arith.constant 0 : index
    %23 = vector.load %arg8[%c0_17, %c0_18] : memref<256x128xbf16, #tpu.memory_space<vmem>>, vector<256x128xbf16>
    tpu.vector_store %arg8[%c0_17, %c0_18], %22 {strides = array<i32>} : memref<256x128xbf16, #tpu.memory_space<vmem>>, vector<256x128xbf16>,
    return
  }
  func.func @transform_0(%arg0: i32) -> (i32, i32) {
    %c0_i32 = arith.constant 0 : i32
    %c0_i32_0 = arith.constant 0 : i32
    return %arg0, %c0_i32 : i32, i32
  }
  func.func @transform_1(%arg0: i32) -> (i32, i32) {
    %c0_i32 = arith.constant 0 : i32
    %c0_i32_0 = arith.constant 0 : i32
    %c0_i32_1 = arith.constant 0 : i32
    return %c0_i32, %c0_i32_0 : i32, i32
  }
  func.func @transform_2(%arg0: i32) -> (i32, i32) {
    %c0_i32 = arith.constant 0 : i32
    %c0_i32_0 = arith.constant 0 : i32
    %c0_i32_1 = arith.constant 0 : i32
    return %c0_i32, %c0_i32_0 : i32, i32
  }
  func.func @transform_3(%arg0: i32) -> (i32, i32) {
    %c0_i32 = arith.constant 0 : i32
    %c0_i32_0 = arith.constant 0 : i32
    %c0_i32_1 = arith.constant 0 : i32
    return %c0_i32, %c0_i32_0 : i32, i32
  }
  func.func @transform_4(%arg0: i32) -> (i32, i32) {
    %c0_i32 = arith.constant 0 : i32
    %c0_i32_0 = arith.constant 0 : i32
    %c0_i32_1 = arith.constant 0 : i32
    return %c0_i32, %c0_i32_0 : i32, i32
  }
  func.func @transform_5(%arg0: i32) -> (i32, i32) {
    %c0_i32 = arith.constant 0 : i32
    %c0_i32_0 = arith.constant 0 : i32
    %c0_i32_1 = arith.constant 0 : i32
    return %c0_i32, %c0_i32_0 : i32, i32
  }
  func.func @transform_6(%arg0: i32) -> (i32, i32) {
    %c0_i32 = arith.constant 0 : i32
    %c0_i32_0 = arith.constant 0 : i32
    %c0_i32_1 = arith.constant 0 : i32
    return %c0_i32, %c0_i32_0 : i32, i32
  }
  func.func @transform_7(%arg0: i32) -> (i32, i32) {
    %c0_i32 = arith.constant 0 : i32
    %c0_i32_0 = arith.constant 0 : i32
    return %arg0, %c0_i32 : i32, i32
  }
}

</mosaic_0001>

<bundles_post_ra>
// kernel: tpu_custom_call.1
= control target key start
LH: loop header
LB: loop body
LE: loop exit
PB: predicated region body
PF: predicated region fallthrough
CT: control target
= control target key end

     0   :  { %vm148_vm0 = vcmask 130048   ;;  %s1851_s0 = inlined_call_operand.vmem [shape: bf16[256,16], index: 0, kind: input, shape index: {}]   ;;  %s1852_s1 = inlined_call_operand.vmem [shape: bf16[16,128], index: 1, kind: input, shape index: {}]   ;;  %s1853_s2 = inlined_call_operand.vmem [shape: bf16[1,128], index: 2, kind: input, shape index: {}]   ;;  %s1854_s3 = inlined_call_operand.vmem [shape: bf16[128,128], index: 3, kind: input, shape index: {}]   ;;  %s1855_s4 = inlined_call_operand.vmem [shape: bf16[1,128], index: 4, kind: input, shape index: {}]   ;;  %s1856_s5 = inlined_call_operand.vmem [shape: bf16[128,128], index: 5, kind: input, shape index: {}]   ;;  %s1857_s6 = inlined_call_operand.vmem [shape: f32[1,128], index: 6, kind: input, shape index: {}]   ;;  %s1858_s7 = inlined_call_operand.hbm [shape: bf16[256,128], index: 7, kind: output, shape index: {}]  }
   0x1   :  { %v1513_v0 = vld [vmem:[%s1852_s1] sm:$0xff]   ;;  %v1515_v2 = vld [vmem:[%s1851_s0 + $0x8] sm:$0xff]   ;;  %v1516_v3 = vld [vmem:[%s1851_s0 + $0x10] sm:$0xff]  }
   0x2   :  { %v1514_v1 = vld [vmem:[%s1851_s0] sm:$0xff]   ;;  %1377 = vmatprep.subr.bf16.mxu0 %v1513_v0  ;;  %1507 = vmatprep.subr.bf16.mxu1 %v1513_v0  ;;  %v1517_v4 = vld [vmem:[%s1851_s0 + $0x18] sm:$0xff]   ;;  %v1523_v7 = vld [vmem:[%s1851_s0 + $0x48] sm:$0xff]  }
   0x3   :  { %1378 = vmatpush3.bf16.msra.mxu0 %v1513_v0  ;;  %1379 = vmatprep.mubr.msk.bf16.mxu0 %vm148_vm0, %v1514_v1  ;;  %v1518_v5 = vld [vmem:[%s1851_s0 + $0x20] sm:$0xff]   ;;  %v1524_v8 = vld [vmem:[%s1851_s0 + $0x50] sm:$0xff]   ;;  %v1525_v9 = vld [vmem:[%s1851_s0 + $0x58] sm:$0xff]  }
   0x4   :  { %1508 = vmatpush3.bf16.msra.mxu1 %v1513_v0  ;;  %v1522_v6 = vld [vmem:[%s1851_s0 + $0x40] sm:$0xff]   ;;  %v1519_v10 = vld [vmem:[%s1851_s0 + $0x28] sm:$0xff]   ;;  %v1530_v12 = vld [vmem:[%s1854_s3 + $0x38] sm:$0xff]  }
   0x5   :  { %1395 = vmatprep.mubr.msk.bf16.mxu1 %vm148_vm0, %v1522_v6  ;;  %v1526_v11 = vld [vmem:[%s1851_s0 + $0x60] sm:$0xff]   ;;  %v1531_v13 = vld [vmem:[%s1854_s3 + $0x30] sm:$0xff]   ;;  %1411 = vmatprep.subr.bf16.mxu1 %v1530_v12  ;;  %v1532_v15 = vld [vmem:[%s1854_s3 + $0x28] sm:$0xff]  }
   0x6   :  { %1380 = vmatmul.mubr.msk.bf16.vlgmr.msra.gmra.mxu0 %vm148_vm0, %v1515_v2  ;;  %v1520_v14 = vld [vmem:[%s1851_s0 + $0x30] sm:$0xff]   ;;  %v1527_v16 = vld [vmem:[%s1851_s0 + $0x68] sm:$0xff]   ;;  %v1521_v18 = vld [vmem:[%s1851_s0 + $0x38] sm:$0xff]  }
   0x7   :  { %1383 = vmatprep.mubr.msk.bf16.mxu0 %vm148_vm0, %v1516_v3  ;;  %1396 = vmatmul.mubr.msk.bf16.vlgmr.msra.gmra.mxu1 %vm148_vm0, %v1523_v7  ;;  %v1528_v17 = vld [vmem:[%s1851_s0 + $0x70] sm:$0xff]   ;;  %v1533_v19 = vld [vmem:[%s1854_s3 + $0x20] sm:$0xff]  }
   0x8   :  { %1399 = vmatprep.mubr.msk.bf16.mxu1 %vm148_vm0, %v1524_v8  ;;  %1412 = vmatpush3.bf16.msra.mxu1 %v1530_v12 }
   0x9   :  { %1413 = vmatprep.subr.bf16.mxu1 %v1531_v13 }
   0xc   :  { %1414 = vmatpush3.bf16.msra.mxu1 %v1531_v13 }
   0xd   :  { %1415 = vmatprep.subr.bf16.mxu1 %v1532_v15 }
   0xe   :  { %1384 = vmatmul.mubr.msk.bf16.gmra.mxu0 %vm148_vm0, %v1517_v4 }
   0xf   :  { %1387 = vmatprep.mubr.msk.bf16.mxu0 %vm148_vm0, %v1518_v5  ;;  %1400 = vmatmul.mubr.msk.bf16.gmra.mxu1 %vm148_vm0, %v1525_v9 }
  0x10   :  { %1403 = vmatprep.mubr.msk.bf16.mxu1 %vm148_vm0, %v1526_v11  ;;  %1416 = vmatpush3.bf16.msra.mxu1 %v1532_v15 }
  0x16   :  { %1388 = vmatmul.mubr.msk.bf16.gmra.mxu0 %vm148_vm0, %v1519_v10 }
  0x17   :  { %1391 = vmatprep.mubr.msk.bf16.mxu0 %vm148_vm0, %v1520_v14  ;;  %1404 = vmatmul.mubr.msk.bf16.gmra.mxu1 %vm148_vm0, %v1527_v16 }
  0x18   :  { %1407 = vmatprep.mubr.msk.bf16.mxu1 %vm148_vm0, %v1528_v17 }
  0x19   :  { %12 = vsyncpa [#allocation3], 0  ;;  %1417 = vmatprep.subr.bf16.mxu1 %v1533_v19  ;;  %v1534_v20 = vld [vmem:[%s1854_s3 + $0x18] sm:$0xff]   ;;  %v1535_v22 = vld [vmem:[%s1854_s3 + $0x10] sm:$0xff]   ;;  %v378_v30 = vlaneseq  ;;  %v1568_v49 = vmov 0  }
  0x1a   :  { %v1529_v21 = vld [vmem:[%s1851_s0 + $0x78] sm:$0xff]   ;;  %1418 = vmatpush3.bf16.msra.mxu1 %v1533_v19  ;;  %v1536_v23 = vld [vmem:[%s1854_s3 + $0x8] sm:$0xff]   ;;  %v1537_v24 = vld [vmem:[%s1854_s3] sm:$0xff]  }
  0x1b   :  { %1419 = vmatprep.subr.bf16.mxu1 %v1534_v20  ;;  %v1538_v25 = vld [vmem:[%s1856_s5 + $0x38] sm:$0xff]   ;;  %v1539_v26 = vld [vmem:[%s1856_s5 + $0x30] sm:$0xff]   ;;  %v1540_v27 = vld [vmem:[%s1856_s5 + $0x28] sm:$0xff]   ;;  %v1718_v31 = vshrl.u32 %v378_v30, 7 }
  0x1c   :  { %1459 = vmatprep.subr.bf16.mxu0 %v1538_v25  ;;  %v1541_v28 = vld [vmem:[%s1856_s5 + $0x20] sm:$0xff]   ;;  %v1542_v29 = vld [vmem:[%s1856_s5 + $0x18] sm:$0xff]  }
  0x1d   :  { %1460 = vmatpush3.bf16.msra.mxu0 %v1538_v25  ;;  %v374_v32 = vld [vmem:[%s1853_s2] sm:$0x1]  ;;  %v380_v35 = vsub.s32 0, %v1718_v31 }
  0x1e   :  { %1392 = vmatmul.mubr.msk.bf16.gmra.mxu0 %vm148_vm0, %v1521_v18  ;;  %1420 = vmatpush3.bf16.msra.mxu1 %v1534_v20  ;;  %v376_v34 = vpack.i.b16 %v374_v32, %v374_v32 }
  0x1f   :  { %1408 = vmatmul.mubr.msk.bf16.gmra.mxu1 %vm148_vm0, %v1529_v21  ;;  %1421 = vmatprep.subr.bf16.mxu1 %v1535_v22 }
  0x20   :  { %1461 = vmatprep.subr.bf16.mxu0 %v1539_v26  ;;  %v1726_v38 = vrot.slane %v376_v34, %v380_v35 }
  0x21   :  { %1462 = vmatpush3.bf16.msra.mxu0 %v1539_v26 }
  0x22   :  { %1422 = vmatpush3.bf16.msra.mxu1 %v1535_v22  ;;  %1463 = vmatprep.subr.bf16.mxu0 %v1540_v27 }
  0x23   :  { %1423 = vmatprep.subr.bf16.mxu1 %v1536_v23 }
  0x25   :  { %1464 = vmatpush3.bf16.msra.mxu0 %v1540_v27 }
  0x26   :  { %1424 = vmatpush3.bf16.msra.mxu1 %v1536_v23  ;;  %1465 = vmatprep.subr.bf16.mxu0 %v1541_v28 }
  0x27   :  { %1425 = vmatprep.subr.bf16.mxu1 %v1537_v24 }
  0x29   :  { %1466 = vmatpush3.bf16.msra.mxu0 %v1541_v28 }
  0x2a   :  { %1426 = vmatpush3.bf16.msra.mxu1 %v1537_v24  ;;  %1467 = vmatprep.subr.bf16.mxu0 %v1542_v29 }
  0x2d   :  { %1468 = vmatpush3.bf16.msra.mxu0 %v1542_v29 }
  0xc6   :  { %v1381_v33 = vpop.f32.mrf.mxu0 }
  0xc7   :  { %v1728_v41 = vpop.f32.mrf.mxu1 }
  0xc8   :  { %v231_v36 = vpop.f32.mrf.mxu0 }
  0xc9   :  { %v295_v45 = vpop.f32.mrf.mxu1 }
  0xca   :  { %v1382_v37 = vpop.f32.mrf.mxu0 }
  0xcb   :  { %v359_v39 = vpack.c.bf16 %v1382_v37, %v1381_v33  ;;  %v1398_v48 = vpop.f32.mrf.mxu1 }
  0xcc   :  { %v234_v40 = vpop.f32.mrf.mxu0  ;;  %v367_v28 = vpack.c.bf16 %v1398_v48, %v1728_v41 }
  0xcd   :  { %v358_v42 = vpack.c.bf16 %v234_v40, %v231_v36  ;;  %v383_v43 = vadd.bf16 %v1726_v38, %v359_v39  ;;  %v298_v53 = vpop.f32.mrf.mxu1 }
  0xce   :  { %v1385_v44 = vpop.f32.mrf.mxu0  ;;  %v366_v14 = vpack.c.bf16 %v298_v53, %v295_v45  ;;  %v391_v33 = vadd.bf16 %v1726_v38, %v367_v28 }
  0xcf   :  { %v382_v46 = vadd.bf16 %v1726_v38, %v358_v42  ;;  %v399_v51 = vmax.bf16 %v1568_v49, %v383_v43  ;;  %v1401_v56 = vpop.f32.mrf.mxu1 }
  0xd0   :  { %v247_v47 = vpop.f32.mrf.mxu0  ;;  %v390_v21 = vadd.bf16 %v1726_v38, %v366_v14  ;;  %v407_v40 = vmax.bf16 %v1568_v49, %v391_v33 }
  0xd1   :  { %v398_v50 = vmax.bf16 %v1568_v49, %v382_v46  ;;  %v311_v60 = vpop.f32.mrf.mxu1 }
  0xd2   :  { %v1386_v52 = vpop.f32.mrf.mxu0  ;;  %v406_v26 = vmax.bf16 %v1568_v49, %v390_v21 }
  0xd3   :  { %v361_v54 = vpack.c.bf16 %v1386_v52, %v1385_v44  ;;  %1427 = vmatprep.mubr.bf16.mxu1 %v398_v50  ;;  %v1402_v63 = vpop.f32.mrf.mxu1 }
  0xd4   :  { %v250_v55 = vpop.f32.mrf.mxu0  ;;  %1428 = vmatmul.mubr.bf16.vlgmr.msra.gmra.mxu1 %v399_v51  ;;  %v369_v39 = vpack.c.bf16 %v1402_v63, %v1401_v56 }
  0xd5   :  { %v360_v57 = vpack.c.bf16 %v250_v55, %v247_v47  ;;  %v385_v58 = vadd.bf16 %v1726_v38, %v361_v54  ;;  %v314_v3 = vpop.f32.mrf.mxu1 }
  0xd6   :  { %v1389_v59 = vpop.f32.mrf.mxu0  ;;  %v368_v27 = vpack.c.bf16 %v314_v3, %v311_v60  ;;  %v393_v43 = vadd.bf16 %v1726_v38, %v369_v39 }
  0xd7   :  { %v384_v61 = vadd.bf16 %v1726_v38, %v360_v57  ;;  %v401_v2 = vmax.bf16 %v1568_v49, %v385_v58  ;;  %v1405_v6 = vpop.f32.mrf.mxu1  ;;  %v1543_v57 = vld [vmem:[%s1856_s5 + $0x10] sm:$0xff]   ;;  %v1544_v58 = vld [vmem:[%s1856_s5 + $0x8] sm:$0xff]  }
  0xd8   :  { %v263_v62 = vpop.f32.mrf.mxu0  ;;  %v392_v32 = vadd.bf16 %v1726_v38, %v368_v27  ;;  %v409_v48 = vmax.bf16 %v1568_v49, %v393_v43  ;;  %1469 = vmatprep.subr.bf16.mxu0 %v1543_v57 }
  0xd9   :  { %v400_v0 = vmax.bf16 %v1568_v49, %v384_v61  ;;  %v327_v10 = vpop.f32.mrf.mxu1  ;;  %1470 = vmatpush3.bf16.msra.mxu0 %v1543_v57 }
  0xda   :  { %v1390_v1 = vpop.f32.mrf.mxu0  ;;  %v408_v36 = vmax.bf16 %v1568_v49, %v392_v32  ;;  %1471 = vmatprep.subr.bf16.mxu0 %v1544_v58 }
  0xdb   :  { %v363_v4 = vpack.c.bf16 %v1390_v1, %v1389_v59  ;;  %1431 = vmatprep.mubr.bf16.mxu1 %v400_v0  ;;  %v1406_v17 = vpop.f32.mrf.mxu1  ;;  %v1545_v59 = vld [vmem:[%s1856_s5] sm:$0xff]  }
  0xdc   :  { %v266_v5 = vpop.f32.mrf.mxu0  ;;  %1432 = vmatmul.mubr.bf16.gmra.mxu1 %v401_v2  ;;  %v371_v47 = vpack.c.bf16 %v1406_v17, %v1405_v6 }
  0xdd   :  { %v362_v7 = vpack.c.bf16 %v266_v5, %v263_v62  ;;  %v387_v8 = vadd.bf16 %v1726_v38, %v363_v4  ;;  %v330_v23 = vpop.f32.mrf.mxu1  ;;  %1472 = vmatpush3.bf16.msra.mxu0 %v1544_v58 }
  0xde   :  { %v1393_v9 = vpop.f32.mrf.mxu0  ;;  %v370_v37 = vpack.c.bf16 %v330_v23, %v327_v10  ;;  %v395_v51 = vadd.bf16 %v1726_v38, %v371_v47  ;;  %1473 = vmatprep.subr.bf16.mxu0 %v1545_v59 }
  0xdf   :  { %v386_v11 = vadd.bf16 %v1726_v38, %v362_v7  ;;  %v403_v16 = vmax.bf16 %v1568_v49, %v387_v8  ;;  %v1409_v30 = vpop.f32.mrf.mxu1 }
  0xe0   :  { %v279_v12 = vpop.f32.mrf.mxu0  ;;  %v394_v41 = vadd.bf16 %v1726_v38, %v370_v37  ;;  %v411_v54 = vmax.bf16 %v1568_v49, %v395_v51 }
  0xe1   :  { %v402_v13 = vmax.bf16 %v1568_v49, %v386_v11  ;;  %v343_v34 = vpop.f32.mrf.mxu1  ;;  %1474 = vmatpush3.bf16.msra.mxu0 %v1545_v59 }
  0xe2   :  { %v1394_v15 = vpop.f32.mrf.mxu0  ;;  %v410_v45 = vmax.bf16 %v1568_v49, %v394_v41 }
  0xe3   :  { %v365_v18 = vpack.c.bf16 %v1394_v15, %v1393_v9  ;;  %1435 = vmatprep.mubr.bf16.mxu1 %v402_v13  ;;  %v1410_v42 = vpop.f32.mrf.mxu1 }
  0xe4   :  { %v282_v19 = vpop.f32.mrf.mxu0  ;;  %1436 = vmatmul.mubr.bf16.gmra.mxu1 %v403_v16  ;;  %v373_v53 = vpack.c.bf16 %v1410_v42, %v1409_v30 }
  0xe5   :  { %v364_v20 = vpack.c.bf16 %v282_v19, %v279_v12  ;;  %v389_v22 = vadd.bf16 %v1726_v38, %v365_v18  ;;  %v346_v44 = vpop.f32.mrf.mxu1 }
  0xe6   :  { %v372_v46 = vpack.c.bf16 %v346_v44, %v343_v34  ;;  %v397_v55 = vadd.bf16 %v1726_v38, %v373_v53 }
  0xe7   :  { %v388_v24 = vadd.bf16 %v1726_v38, %v364_v20  ;;  %v405_v29 = vmax.bf16 %v1568_v49, %v389_v22 }
  0xe8   :  { %v396_v50 = vadd.bf16 %v1726_v38, %v372_v46  ;;  %v413_v56 = vmax.bf16 %v1568_v49, %v397_v55  ;;  %v655_v38 = vld [vmem:[%s1855_s4] sm:$0x1] }
  0xe9   :  { %v404_v25 = vmax.bf16 %v1568_v49, %v388_v24  ;;  %v657_v61 = vpack.i.b16 %v655_v38, %v655_v38 }
  0xea   :  { %v412_v52 = vmax.bf16 %v1568_v49, %v396_v50 }
  0xeb   :  { %1439 = vmatprep.mubr.bf16.mxu1 %v404_v25  ;;  %v1777_v0 = vrot.slane %v657_v61, %v380_v35 }
  0xec   :  { %1440 = vmatmul.mubr.bf16.gmra.mxu1 %v405_v29 }
  0xed   :  { %1443 = vmatprep.mubr.bf16.mxu1 %v406_v26 }
  0xf4   :  { %1444 = vmatmul.mubr.bf16.gmra.mxu1 %v407_v40 }
  0xf5   :  { %1447 = vmatprep.mubr.bf16.mxu1 %v408_v36 }
  0xfc   :  { %1448 = vmatmul.mubr.bf16.gmra.mxu1 %v409_v48 }
  0xfd   :  { %1451 = vmatprep.mubr.bf16.mxu1 %v410_v45 }
 0x104   :  { %1452 = vmatmul.mubr.bf16.gmra.mxu1 %v411_v54 }
 0x105   :  { %1455 = vmatprep.mubr.bf16.mxu1 %v412_v52 }
 0x10c   :  { %1456 = vmatmul.mubr.bf16.gmra.mxu1 %v413_v56 }
 0x194   :  { %v1429_v60 = vpop.f32.mrf.mxu1 }
 0x196   :  { %v512_v62 = vpop.f32.mrf.mxu1 }
 0x198   :  { %v1430_v63 = vpop.f32.mrf.mxu1 }
 0x199   :  { %v640_v1 = vpack.c.bf16 %v1430_v63, %v1429_v60 }
 0x19a   :  { %v515_v2 = vpop.f32.mrf.mxu1 }
 0x19b   :  { %v639_v3 = vpack.c.bf16 %v515_v2, %v512_v62  ;;  %v664_v4 = vadd.bf16 %v1777_v0, %v640_v1 }
 0x19c   :  { %v1433_v5 = vpop.f32.mrf.mxu1 }
 0x19d   :  { %v663_v6 = vadd.bf16 %v1777_v0, %v639_v3  ;;  %v680_v9 = vmax.bf16 %v1568_v49, %v664_v4 }
 0x19e   :  { %v528_v7 = vpop.f32.mrf.mxu1 }
 0x19f   :  { %v679_v8 = vmax.bf16 %v1568_v49, %v663_v6 }
 0x1a0   :  { %v1434_v10 = vpop.f32.mrf.mxu1 }
 0x1a1   :  { %v642_v11 = vpack.c.bf16 %v1434_v10, %v1433_v5  ;;  %1475 = vmatprep.mubr.bf16.mxu0 %v679_v8 }
 0x1a2   :  { %v531_v12 = vpop.f32.mrf.mxu1  ;;  %1476 = vmatmul.mubr.bf16.vlgmr.msra.gmra.mxu0 %v680_v9 }
 0x1a3   :  { %v641_v31 = vpack.c.bf16 %v531_v12, %v528_v7  ;;  %v666_v35 = vadd.bf16 %v1777_v0, %v642_v11 }
 0x1a4   :  { %v1437_v13 = vpop.f32.mrf.mxu1 }
 0x1a5   :  { %v665_v14 = vadd.bf16 %v1777_v0, %v641_v31  ;;  %v682_v18 = vmax.bf16 %v1568_v49, %v666_v35 }
 0x1a6   :  { %v544_v15 = vpop.f32.mrf.mxu1 }
 0x1a7   :  { %v681_v16 = vmax.bf16 %v1568_v49, %v665_v14 }
 0x1a8   :  { %v1438_v17 = vpop.f32.mrf.mxu1 }
 0x1a9   :  { %v644_v19 = vpack.c.bf16 %v1438_v17, %v1437_v13  ;;  %1479 = vmatprep.mubr.bf16.mxu0 %v681_v16 }
 0x1aa   :  { %v547_v20 = vpop.f32.mrf.mxu1  ;;  %1480 = vmatmul.mubr.bf16.gmra.mxu0 %v682_v18 }
 0x1ab   :  { %v643_v21 = vpack.c.bf16 %v547_v20, %v544_v15  ;;  %v668_v22 = vadd.bf16 %v1777_v0, %v644_v19  ;;  %v1814_v15 = vld [vmem:[%s1857_s6] ss:$0 sm:$0xff]  ;;  %s1569_s6 = smov [#allocation2]  }
 0x1ac   :  { %v1441_v23 = vpop.f32.mrf.mxu1  ;;  %s1092_s19 = sshll.u32 %s1569_s6, 4  ;;  %s1093_s19 = int_to_ptr.vmem [resolvable:$true] %s1092_s19 }
 0x1ad   :  { %v667_v24 = vadd.bf16 %v1777_v0, %v643_v21  ;;  %v684_v28 = vmax.bf16 %v1568_v49, %v668_v22  ;;  %s1546_s20 = scalar_lea.vmem %s1093_s19, 2048  ;;  %p1551_p1 = scmp.lt.s32.totalorder %s1093_s19, %s1093_s19 }
 0x1ae   :  { %v560_v25 = vpop.f32.mrf.mxu1  ;;  %p1547_p0 = scmp.ne.s32.totalorder %s1093_s19, %s1546_s20  ;;  %p1552_p2 = scmp.lt.s32.totalorder %s1546_s20, %s1546_s20 }
 0x1af   :  { %v683_v26 = vmax.bf16 %v1568_v49, %v667_v24 }
 0x1b0   :  { %v1442_v27 = vpop.f32.mrf.mxu1  ;;  %p1553_p3 = por %p1552_p2, %p1551_p1 }
 0x1b1   :  { %v646_v29 = vpack.c.bf16 %v1442_v27, %v1441_v23  ;;  %1483 = vmatprep.mubr.bf16.mxu0 %v683_v26 }
 0x1b2   :  { %v563_v30 = vpop.f32.mrf.mxu1  ;;  %1484 = vmatmul.mubr.bf16.gmra.mxu0 %v684_v28  ;;  %p1554_p4 = pnand %p1553_p3, %p1547_p0 }
 0x1b3   :  { %v645_v32 = vpack.c.bf16 %v563_v30, %v560_v25  ;;  %v670_v33 = vadd.bf16 %v1777_v0, %v646_v29 }
 0x1b4   :  { %v1445_v34 = vpop.f32.mrf.mxu1 }
 0x1b5   :  { %v669_v36 = vadd.bf16 %v1777_v0, %v645_v32  ;;  %v686_v42 = vmax.bf16 %v1568_v49, %v670_v33 }
 0x1b6   :  { %v576_v37 = vpop.f32.mrf.mxu1 }
 0x1b7   :  { %v685_v39 = vmax.bf16 %v1568_v49, %v669_v36 }
 0x1b8   :  { %v1446_v40 = vpop.f32.mrf.mxu1 }
 0x1b9   :  { %v648_v41 = vpack.c.bf16 %v1446_v40, %v1445_v34  ;;  %1487 = vmatprep.mubr.bf16.mxu0 %v685_v39 }
 0x1ba   :  { %v579_v43 = vpop.f32.mrf.mxu1  ;;  %1488 = vmatmul.mubr.bf16.gmra.mxu0 %v686_v42 }
 0x1bb   :  { %v647_v44 = vpack.c.bf16 %v579_v43, %v576_v37  ;;  %v672_v45 = vadd.bf16 %v1777_v0, %v648_v41 }
 0x1bc   :  { %v1449_v46 = vpop.f32.mrf.mxu1 }
 0x1bd   :  { %v671_v47 = vadd.bf16 %v1777_v0, %v647_v44  ;;  %v688_v52 = vmax.bf16 %v1568_v49, %v672_v45 }
 0x1be   :  { %v592_v48 = vpop.f32.mrf.mxu1 }
 0x1bf   :  { %v687_v50 = vmax.bf16 %v1568_v49, %v671_v47 }
 0x1c0   :  { %v1450_v51 = vpop.f32.mrf.mxu1 }
 0x1c1   :  { %v650_v53 = vpack.c.bf16 %v1450_v51, %v1449_v46  ;;  %1491 = vmatprep.mubr.bf16.mxu0 %v687_v50 }
 0x1c2   :  { %v595_v54 = vpop.f32.mrf.mxu1  ;;  %1492 = vmatmul.mubr.bf16.gmra.mxu0 %v688_v52 }
 0x1c3   :  { %v649_v55 = vpack.c.bf16 %v595_v54, %v592_v48  ;;  %v674_v56 = vadd.bf16 %v1777_v0, %v650_v53 }
 0x1c4   :  { %v1453_v57 = vpop.f32.mrf.mxu1 }
 0x1c5   :  { %v673_v58 = vadd.bf16 %v1777_v0, %v649_v55  ;;  %v690_v61 = vmax.bf16 %v1568_v49, %v674_v56 }
 0x1c6   :  { %v608_v59 = vpop.f32.mrf.mxu1 }
 0x1c7   :  { %v689_v38 = vmax.bf16 %v1568_v49, %v673_v58 }
 0x1c8   :  { %v1454_v60 = vpop.f32.mrf.mxu1 }
 0x1c9   :  { %v652_v62 = vpack.c.bf16 %v1454_v60, %v1453_v57  ;;  %1495 = vmatprep.mubr.bf16.mxu0 %v689_v38 }
 0x1ca   :  { %v611_v63 = vpop.f32.mrf.mxu1  ;;  %1496 = vmatmul.mubr.bf16.gmra.mxu0 %v690_v61 }
 0x1cb   :  { %v651_v1 = vpack.c.bf16 %v611_v63, %v608_v59  ;;  %v676_v2 = vadd.bf16 %v1777_v0, %v652_v62 }
 0x1cc   :  { %v1457_v3 = vpop.f32.mrf.mxu1 }
 0x1cd   :  { %v675_v4 = vadd.bf16 %v1777_v0, %v651_v1  ;;  %v692_v8 = vmax.bf16 %v1568_v49, %v676_v2 }
 0x1ce   :  { %v624_v5 = vpop.f32.mrf.mxu1 }
 0x1cf   :  { %v691_v6 = vmax.bf16 %v1568_v49, %v675_v4 }
 0x1d0   :  { %v1458_v7 = vpop.f32.mrf.mxu1 }
 0x1d1   :  { %v654_v9 = vpack.c.bf16 %v1458_v7, %v1457_v3  ;;  %1499 = vmatprep.mubr.bf16.mxu0 %v691_v6 }
 0x1d2   :  { %v627_v10 = vpop.f32.mrf.mxu1  ;;  %1500 = vmatmul.mubr.bf16.gmra.mxu0 %v692_v8 }
 0x1d3   :  { %v653_v11 = vpack.c.bf16 %v627_v10, %v624_v5  ;;  %v678_v12 = vadd.bf16 %v1777_v0, %v654_v9 }
 0x1d5   :  { %v677_v31 = vadd.bf16 %v1777_v0, %v653_v11  ;;  %v694_v13 = vmax.bf16 %v1568_v49, %v678_v12 }
 0x1d7   :  { %v693_v35 = vmax.bf16 %v1568_v49, %v677_v31 }
 0x1d9   :  { %1503 = vmatprep.mubr.bf16.mxu0 %v693_v35 }
 0x1da   :  { %1504 = vmatmul.mubr.bf16.gmra.mxu0 %v694_v13 }
 0x262   :  { %v1477_v14 = vpop.f32.mrf.mxu0 }
 0x263   :  { %v809_v18 = vadd.f32 %v1477_v14, %v1814_v15 }
 0x264   :  { %v800_v16 = vpop.f32.mrf.mxu0 }
 0x265   :  { %v801_v0 = vadd.f32 %v1814_v15, %v800_v16 }
 0x266   :  { %v1478_v17 = vpop.f32.mrf.mxu0 }
 0x267   :  { %v812_v19 = vadd.f32 %v1478_v17, %v1814_v15 }
 0x268   :  { %v803_v20 = vpop.f32.mrf.mxu0 }
 0x269   :  { %v1225_v21 = vpack.c.bf16 %v812_v19, %v809_v18  ;;  %v804_v49 = vadd.f32 %v1814_v15, %v803_v20 }
 0x26a   :  { %v1481_v22 = vpop.f32.mrf.mxu0 }
 0x26b   :  { %1297 = vst [vmem:[#allocation2 + $0x8] sm:$0xff] %v1225_v21   ;;  %v1220_v23 = vpack.c.bf16 %v804_v49, %v801_v0  ;;  %v825_v26 = vadd.f32 %v1481_v22, %v1814_v15 }
 0x26c   :  { %v816_v24 = vpop.f32.mrf.mxu0 }
 0x26d   :  { %1221 = vst [vmem:[#allocation2] sm:$0xff] %v1220_v23   ;;  %v817_v29 = vadd.f32 %v1814_v15, %v816_v24 }
 0x26e   :  { %v1482_v25 = vpop.f32.mrf.mxu0 }
 0x26f   :  { %v828_v27 = vadd.f32 %v1482_v25, %v1814_v15 }
 0x270   :  { %v819_v28 = vpop.f32.mrf.mxu0 }
 0x271   :  { %v1235_v30 = vpack.c.bf16 %v828_v27, %v825_v26  ;;  %v820_v32 = vadd.f32 %v1814_v15, %v819_v28 }
 0x272   :  { %v1485_v33 = vpop.f32.mrf.mxu0 }
 0x273   :  { %1299 = vst [vmem:[#allocation2 + $0x18] sm:$0xff] %v1235_v30   ;;  %v1230_v34 = vpack.c.bf16 %v820_v32, %v817_v29  ;;  %v841_v39 = vadd.f32 %v1485_v33, %v1814_v15 }
 0x274   :  { %v832_v36 = vpop.f32.mrf.mxu0 }
 0x275   :  { %1298 = vst [vmem:[#allocation2 + $0x10] sm:$0xff] %v1230_v34   ;;  %v833_v41 = vadd.f32 %v1814_v15, %v832_v36 }
 0x276   :  { %v1486_v37 = vpop.f32.mrf.mxu0 }
 0x277   :  { %v844_v40 = vadd.f32 %v1486_v37, %v1814_v15 }
 0x278   :  { %v835_v42 = vpop.f32.mrf.mxu0 }
 0x279   :  { %v1245_v43 = vpack.c.bf16 %v844_v40, %v841_v39  ;;  %v836_v44 = vadd.f32 %v1814_v15, %v835_v42 }
 0x27a   :  { %v1489_v45 = vpop.f32.mrf.mxu0 }
 0x27b   :  { %1301 = vst [vmem:[#allocation2 + $0x28] sm:$0xff] %v1245_v43   ;;  %v1240_v46 = vpack.c.bf16 %v836_v44, %v833_v41  ;;  %v857_v50 = vadd.f32 %v1489_v45, %v1814_v15 }
 0x27c   :  { %v848_v47 = vpop.f32.mrf.mxu0 }
 0x27d   :  { %1300 = vst [vmem:[#allocation2 + $0x20] sm:$0xff] %v1240_v46   ;;  %v849_v53 = vadd.f32 %v1814_v15, %v848_v47 }
 0x27e   :  { %v1490_v48 = vpop.f32.mrf.mxu0 }
 0x27f   :  { %v860_v51 = vadd.f32 %v1490_v48, %v1814_v15 }
 0x280   :  { %v851_v52 = vpop.f32.mrf.mxu0 }
 0x281   :  { %v1255_v54 = vpack.c.bf16 %v860_v51, %v857_v50  ;;  %v852_v55 = vadd.f32 %v1814_v15, %v851_v52 }
 0x282   :  { %v1493_v56 = vpop.f32.mrf.mxu0 }
 0x283   :  { %1303 = vst [vmem:[#allocation2 + $0x38] sm:$0xff] %v1255_v54   ;;  %v1250_v57 = vpack.c.bf16 %v852_v55, %v849_v53  ;;  %v873_v38 = vadd.f32 %v1493_v56, %v1814_v15 }
 0x284   :  { %v864_v58 = vpop.f32.mrf.mxu0 }
 0x285   :  { %1302 = vst [vmem:[#allocation2 + $0x30] sm:$0xff] %v1250_v57   ;;  %v865_v62 = vadd.f32 %v1814_v15, %v864_v58 }
 0x286   :  { %v1494_v59 = vpop.f32.mrf.mxu0 }
 0x287   :  { %v876_v60 = vadd.f32 %v1494_v59, %v1814_v15 }
 0x288   :  { %v867_v61 = vpop.f32.mrf.mxu0 }
 0x289   :  { %v1265_v63 = vpack.c.bf16 %v876_v60, %v873_v38  ;;  %v868_v1 = vadd.f32 %v1814_v15, %v867_v61 }
 0x28a   :  { %v1497_v2 = vpop.f32.mrf.mxu0 }
 0x28b   :  { %1305 = vst [vmem:[#allocation2 + $0x48] sm:$0xff] %v1265_v63   ;;  %v1260_v3 = vpack.c.bf16 %v868_v1, %v865_v62  ;;  %v889_v6 = vadd.f32 %v1497_v2, %v1814_v15 }
 0x28c   :  { %v880_v4 = vpop.f32.mrf.mxu0 }
 0x28d   :  { %1304 = vst [vmem:[#allocation2 + $0x40] sm:$0xff] %v1260_v3   ;;  %v881_v9 = vadd.f32 %v1814_v15, %v880_v4 }
 0x28e   :  { %v1498_v5 = vpop.f32.mrf.mxu0 }
 0x28f   :  { %v892_v7 = vadd.f32 %v1498_v5, %v1814_v15 }
 0x290   :  { %v883_v8 = vpop.f32.mrf.mxu0 }
 0x291   :  { %v1275_v10 = vpack.c.bf16 %v892_v7, %v889_v6  ;;  %v884_v11 = vadd.f32 %v1814_v15, %v883_v8 }
 0x292   :  { %v1501_v12 = vpop.f32.mrf.mxu0 }
 0x293   :  { %1307 = vst [vmem:[#allocation2 + $0x58] sm:$0xff] %v1275_v10   ;;  %v1270_v31 = vpack.c.bf16 %v884_v11, %v881_v9  ;;  %v905_v14 = vadd.f32 %v1501_v12, %v1814_v15 }
 0x294   :  { %v896_v35 = vpop.f32.mrf.mxu0 }
 0x295   :  { %1306 = vst [vmem:[#allocation2 + $0x50] sm:$0xff] %v1270_v31   ;;  %v897_v18 = vadd.f32 %v1814_v15, %v896_v35 }
 0x296   :  { %v1502_v13 = vpop.f32.mrf.mxu0 }
 0x297   :  { %v908_v16 = vadd.f32 %v1502_v13, %v1814_v15 }
 0x298   :  { %v899_v17 = vpop.f32.mrf.mxu0 }
 0x299   :  { %v1285_v19 = vpack.c.bf16 %v908_v16, %v905_v14  ;;  %v900_v20 = vadd.f32 %v1814_v15, %v899_v17 }
 0x29a   :  { %v1505_v0 = vpop.f32.mrf.mxu0 }
 0x29b   :  { %1309 = vst [vmem:[#allocation2 + $0x68] sm:$0xff] %v1285_v19   ;;  %v1280_v21 = vpack.c.bf16 %v900_v20, %v897_v18  ;;  %v921_v23 = vadd.f32 %v1505_v0, %v1814_v15 }
 0x29c   :  { %v912_v49 = vpop.f32.mrf.mxu0 }
 0x29d   :  { %1308 = vst [vmem:[#allocation2 + $0x60] sm:$0xff] %v1280_v21   ;;  %v913_v26 = vadd.f32 %v1814_v15, %v912_v49 }
 0x29e   :  { %v1506_v22 = vpop.f32.mrf.mxu0 }
 0x29f   :  { %v924_v24 = vadd.f32 %v1506_v22, %v1814_v15 }
 0x2a0   :  { %v915_v25 = vpop.f32.mrf.mxu0 }
 0x2a1   :  { %v1295_v27 = vpack.c.bf16 %v924_v24, %v921_v23  ;;  %v916_v28 = vadd.f32 %v1814_v15, %v915_v25 }
 0x2a3   :  { %1311 = vst [vmem:[#allocation2 + $0x78] sm:$0xff] %v1295_v27   ;;  %v1290_v29 = vpack.c.bf16 %v916_v28, %v913_v26 }
 0x2a5   :  { %1310 = vst [vmem:[#allocation2 + $0x70] sm:$0xff] %v1290_v29  }
 0x2a6   :  { %1557 = shalt.err (!%p1554_p4)
}
 0x2a7   :  { %s1570_s21 = smov 64   ;;  %s1571_s22 = smov 4  }
 0x2a8   :  { %1098 = dma.vmem_to_hbm [thread:$0]  %s1093_s19, 2048, %s1858_s7, [#allocation3], %s1570_s21, %s1570_s21, %s1571_s22  }
 0x2a9   :  { %1566 = dma.done.wait [#allocation3], 2048  }
 0x2aa   :  { %1567 = vsyncadd [#allocation3], 4294965248 }
 0x2ab   :  { %1102 = vsyncpa [#allocation3], 1 }

</bundles_post_ra>
